<compile_context>
chip_gen: v5e
topology: v5e:2x2
jax: 0.10.0
libtpu: 0.0.40
codegen_flags: <defaults>
</compile_context>

<pallas_src>
import functools

import jax
import jax.numpy as jnp
from jax.experimental import pallas as pl
from jax.experimental.pallas import tpu as pltpu

LANES = 128


def _round_up(x, m):
    return ((x + m - 1) // m) * m


@functools.lru_cache(maxsize=None)
def _hw_params():
    """Returns (num_tensorcores, scoped_vmem_limit_bytes) for the local TPU."""
    try:
        phys_vmem = int(pltpu.get_tpu_info().vmem_capacity_bytes)
    except Exception:
        phys_vmem = 64 * 1024 * 1024            # conservative (v7x-sized)
    try:
        kind = jax.devices()[0].device_kind.lower().replace(" ", "")
    except Exception:
        kind = ""
    two_core = any(t in kind for t in ("v7", "7x", "v4", "v5p"))
    vmem_limit = min(phys_vmem * 3 // 4, 96 * 1024 * 1024)
    if "v7" in kind or "7x" in kind:
        vmem_limit = min(vmem_limit, 48 * 1024 * 1024)   # 64 MiB physical / TC
    vmem_limit = max(vmem_limit, 16 * 1024 * 1024)
    return (2 if two_core else 1), int(vmem_limit)


def _make_kernel(b_total, d_feat, groups, margin):
    """Kernel closure over static batch size, feature dim, pack factor, margin."""

    def kernel(p_ref, n_ref, s_ref, out_ref, acc_ref):
        c = pl.program_id(0)                 # core split       ("parallel")
        i = pl.program_id(1)                 # row-tile index   ("arbitrary")
        nsteps = pl.num_programs(1)

        @pl.when(i == 0)
        def _():
            acc_ref[...] = jnp.zeros_like(acc_ref)

        p = p_ref[...].astype(jnp.float32)
        n = n_ref[...].astype(jnp.float32)
        s = s_ref[...].astype(jnp.float32)
        dpsq = (p - s) * (p - s)
        dnsq = (n - s) * (n - s)

        tile_r = dpsq.shape[0]
        # Global packed-row index from the RAW grid coordinates (NOT the
        # clamped block index) so clamped duplicate blocks and the stale
        # partial tail of the last block contribute exactly zero.
        prow0 = (c * nsteps + i) * tile_r
        prow = prow0 + jax.lax.broadcasted_iota(jnp.int32, (tile_r, 1), 0)

        step_sum = jnp.zeros((1, 1), jnp.float32)
        for g in range(groups):              # static unroll (groups <= 16)
            lo, hi = g * d_feat, (g + 1) * d_feat
            dp2 = jnp.sum(dpsq[:, lo:hi], axis=-1, keepdims=True)   # (tile_r,1)
            dn2 = jnp.sum(dnsq[:, lo:hi], axis=-1, keepdims=True)
            # Only the negative branch needs the actual distance (for the
            # hinge); the positive branch uses the squared distance directly.
            hinge = jnp.maximum(jnp.float32(margin) - jnp.sqrt(dn2), 0.0)
            per_row = 0.5 * dp2 + 0.5 * hinge * hinge
            orig_row = prow * groups + g
            # jnp.where select (not multiply): stale NaN/Inf cannot leak.
            per_row = jnp.where(orig_row < b_total, per_row, 0.0)
            step_sum = step_sum + jnp.sum(per_row)

        acc_ref[...] += step_sum

        @pl.when(i == nsteps - 1)
        def _():
            out_ref[...] = jnp.full(out_ref.shape, jnp.sum(acc_ref[...]),
                                    dtype=out_ref.dtype)

    return kernel


@functools.partial(jax.jit,
                   static_argnames=("margin", "max_tile_rows", "force_nsplit"))
def triplet_loss(image_p, image_n, sketch, *, margin=1.0,
                 max_tile_rows=None, force_nsplit=None):
    """image_p, image_n, sketch: (B, D) arrays.  Returns the scalar loss (f32)."""
    B, D = image_p.shape
    itemsize = jnp.dtype(image_p.dtype).itemsize
    ncores, vmem_limit = _hw_params()

    # Lane packing for narrow feature dims: free row-major reshape
    # (B, D) -> (B*D/128, 128); each packed row carries `groups` original rows.
    if D < LANES and LANES % D == 0 and D >= 8 and B % (LANES // D) == 0:
        groups = LANES // D
    else:
        groups = 1
    row_w = groups * D                     # packed row width (lane dim)
    n_rows = B // groups                   # packed row count
    image_p = image_p.reshape(n_rows, row_w)
    image_n = image_n.reshape(n_rows, row_w)
    sketch = sketch.reshape(n_rows, row_w)

    # Row tile sized from the VMEM budget: 3 inputs x 2 pipeline buffers plus
    # ~3 f32 whole-tile temporaries of headroom; multiple of 8 sublanes.
    tile_budget = vmem_limit * 3 // 4
    bytes_per_row = row_w * (3 * 2 * itemsize + 3 * 4)
    rows_cap = max(8, (tile_budget // bytes_per_row) // 8 * 8)
    if max_tile_rows is not None:
        rows_cap = max(8, min(rows_cap, (max_tile_rows // 8) * 8))
    tile_r = int(min(rows_cap, _round_up(n_rows, 8)))

    tiles_total = pl.cdiv(n_rows, tile_r)
    nsplit = ncores if force_nsplit is None else int(force_nsplit)
    nsplit = max(1, min(nsplit, tiles_total))
    tiles_per_split = pl.cdiv(tiles_total, nsplit)
    last_block = tiles_total - 1

    # Clamped block index (no wrapper-side padding / extra HBM copies);
    # overhang and tail rows are masked in-kernel from the raw grid coords.
    def in_index(c, i):
        return (jnp.minimum(c * tiles_per_split + i, last_block), 0)

    in_spec = pl.BlockSpec((tile_r, row_w), in_index)

    cost = pl.CostEstimate(
        flops=8 * B * D + 8 * B,
        transcendentals=B,
        bytes_accessed=3 * B * D * itemsize + nsplit * 8 * LANES * 4,
    )

    partials = pl.pallas_call(
        _make_kernel(B, D, groups, float(margin)),
        out_shape=jax.ShapeDtypeStruct((nsplit, 8, LANES), jnp.float32),
        grid_spec=pltpu.PrefetchScalarGridSpec(
            num_scalar_prefetch=0,
            grid=(nsplit, tiles_per_split),
            in_specs=[in_spec, in_spec, in_spec],
            out_specs=pl.BlockSpec((1, 8, LANES), lambda c, i: (c, 0, 0)),
            scratch_shapes=[pltpu.VMEM((1, 1), jnp.float32)],
        ),
        compiler_params=pltpu.CompilerParams(
            dimension_semantics=("parallel", "arbitrary"),
            vmem_limit_bytes=vmem_limit,
        ),
        cost_estimate=cost,
    )(image_p, image_n, sketch)

    return jnp.sum(partials[:, 0, 0]) / jnp.float32(B)


def triplet_loss_ref(image_p, image_n, sketch, margin=1.0):
    """Pure-JAX reference for checking the kernel."""
    dist_p = jnp.sqrt(jnp.sum((image_p - sketch) ** 2, axis=-1))
    dist_n = jnp.sqrt(jnp.sum((image_n - sketch) ** 2, axis=-1))
    return jnp.mean(0.5 * dist_p**2 + 0.5 * jnp.maximum(margin - dist_n, 0.0) ** 2)


if __name__ == "__main__":
    key = jax.random.PRNGKey(0)

    cases = [
        # (B, D, kwargs)                               exercises
        (64, 128, {}),                                 # single full tile, D >= 128
        (10, 32, {}),                                  # ragged tail mask, unpacked D < 128
        (64, 32, {}),                                  # lane-packed path (4 rows / 128 lanes)
        (22, 128, dict(max_tile_rows=8, force_nsplit=2)),  # multi-tile accumulate,
                                                       # clamped duplicate block, partial tail
    ]
    for B, D, kw in cases:
        k1, k2, k3, key = jax.random.split(key, 4)
        p = jax.random.normal(k1, (B, D), dtype=jnp.float32)
        n = jax.random.normal(k2, (B, D), dtype=jnp.float32)
        s = jax.random.normal(k3, (B, D), dtype=jnp.float32)
        out = triplet_loss(p, n, s, margin=1.0, **kw)
        jax.block_until_ready(out)
        ref = triplet_loss_ref(p, n, s, margin=1.0)
        assert jnp.allclose(out, ref, rtol=1e-5, atol=1e-5), (B, D, out, ref)

    print("KERNEL_OK")
</pallas_src>

<mosaic_0001>
module attributes {stable_mosaic.version = 11 : i64} {
  func.func @kernel(%arg0: i32, %arg1: i32, %arg2: memref<64x128xf32, #tpu.memory_space<vmem>>, %arg3: memref<64x128xf32, #tpu.memory_space<vmem>>, %arg4: memref<64x128xf32, #tpu.memory_space<vmem>>, %arg5: memref<1x8x128xf32, #tpu.memory_space<vmem>>, %arg6: memref<1x1xf32, #tpu.memory_space<vmem>>) attributes {dimension_semantics = [#tpu.dimension_semantics<parallel>, #tpu.dimension_semantics<arbitrary>], iteration_bounds = array<i64: 1, 1>, scalar_prefetch = 0 : i64, scratch_operands = 1 : i64, tpu.core_type = #tpu.core_type<tc>, window_params = [{transform_indices = @transform_0, window_bounds = array<i64: 64, 128>}, {transform_indices = @transform_1, window_bounds = array<i64: 64, 128>}, {transform_indices = @transform_2, window_bounds = array<i64: 64, 128>}, {transform_indices = @transform_3, window_bounds = array<i64: 1, 8, 128>}]} {
    %c0_i32 = arith.constant 0 : i32
    %0 = arith.cmpi eq, %arg1, %c0_i32 : i32
    %1 = arith.extui %0 : i1 to i32
    %c0_i32_0 = arith.constant 0 : i32
    %2 = arith.cmpi ne, %1, %c0_i32_0 : i32
    scf.if %2 {
      %cst_23 = arith.constant 0.000000e+00 : f32
      %54 = vector.broadcast %cst_23 : f32 to vector<1x1xf32>
      %c0_24 = arith.constant 0 : index
      %c0_25 = arith.constant 0 : index
      %55 = vector.load %arg6[%c0_24, %c0_25] : memref<1x1xf32, #tpu.memory_space<vmem>>, vector<1x1xf32>
      tpu.vector_store %arg6[%c0_24, %c0_25], %54 {strides = array<i32>} : memref<1x1xf32, #tpu.memory_space<vmem>>, vector<1x1xf32>,
    } else {
    }
    %c0 = arith.constant 0 : index
    %c0_1 = arith.constant 0 : index
    %3 = vector.load %arg2[%c0, %c0_1] : memref<64x128xf32, #tpu.memory_space<vmem>>, vector<64x128xf32>
    %c0_2 = arith.constant 0 : index
    %c0_3 = arith.constant 0 : index
    %4 = vector.load %arg3[%c0_2, %c0_3] : memref<64x128xf32, #tpu.memory_space<vmem>>, vector<64x128xf32>
    %c0_4 = arith.constant 0 : index
    %c0_5 = arith.constant 0 : index
    %5 = vector.load %arg4[%c0_4, %c0_5] : memref<64x128xf32, #tpu.memory_space<vmem>>, vector<64x128xf32>
    %6 = arith.subf %3, %5 : vector<64x128xf32>
    %7 = arith.subf %3, %5 : vector<64x128xf32>
    %8 = arith.mulf %6, %7 : vector<64x128xf32>
    %9 = arith.subf %4, %5 : vector<64x128xf32>
    %10 = arith.subf %4, %5 : vector<64x128xf32>
    %11 = arith.mulf %9, %10 : vector<64x128xf32>
    %c1_i32 = arith.constant 1 : i32
    %12 = arith.muli %arg0, %c1_i32 : i32
    %13 = arith.addi %12, %arg1 : i32
    %c64_i32 = arith.constant 64 : i32
    %14 = arith.muli %13, %c64_i32 : i32
    %15 = tpu.iota {dimensions = array<i32: 0>} : vector<64x1xi32>
    %16 = vector.broadcast %14 : i32 to vector<64x1xi32>
    %17 = arith.addi %16, %15 : vector<64x1xi32>
    %cst = arith.constant 0.000000e+00 : f32
    %18 = vector.broadcast %cst : f32 to vector<1x1xf32>
    %cst_6 = arith.constant dense<0.000000e+00> : vector<64xf32>
    %19 = vector.multi_reduction <add>, %8, %cst_6 [1] : vector<64x128xf32> to vector<64xf32>
    %20 = vector.shape_cast %19 : vector<64xf32> to vector<64x1xf32>
    %cst_7 = arith.constant dense<0.000000e+00> : vector<64xf32>
    %21 = vector.multi_reduction <add>, %11, %cst_7 [1] : vector<64x128xf32> to vector<64xf32>
    %22 = vector.shape_cast %21 : vector<64xf32> to vector<64x1xf32>
    %23 = math.sqrt %22 : vector<64x1xf32>
    %cst_8 = arith.constant 1.000000e+00 : f32
    %24 = vector.broadcast %cst_8 : f32 to vector<64x1xf32>
    %25 = arith.subf %24, %23 : vector<64x1xf32>
    %cst_9 = arith.constant 0.000000e+00 : f32
    %26 = vector.broadcast %cst_9 : f32 to vector<64x1xf32>
    %27 = arith.maximumf %25, %26 : vector<64x1xf32>
    %cst_10 = arith.constant 5.000000e-01 : f32
    %28 = vector.broadcast %cst_10 : f32 to vector<64x1xf32>
    %29 = arith.mulf %28, %20 : vector<64x1xf32>
    %cst_11 = arith.constant 5.000000e-01 : f32
    %30 = vector.broadcast %cst_11 : f32 to vector<64x1xf32>
    %31 = arith.mulf %30, %27 : vector<64x1xf32>
    %32 = arith.mulf %31, %27 : vector<64x1xf32>
    %33 = arith.addf %29, %32 : vector<64x1xf32>
    %c1_i32_12 = arith.constant 1 : i32
    %34 = vector.broadcast %c1_i32_12 : i32 to vector<64x1xi32>
    %35 = arith.muli %17, %34 : vector<64x1xi32>
    %c0_i32_13 = arith.constant 0 : i32
    %36 = vector.broadcast %c0_i32_13 : i32 to vector<64x1xi32>
    %37 = arith.addi %35, %36 : vector<64x1xi32>
    %c64_i32_14 = arith.constant 64 : i32
    %38 = vector.broadcast %c64_i32_14 : i32 to vector<64x1xi32>
    %39 = arith.cmpi slt, %37, %38 : vector<64x1xi32>
    %cst_15 = arith.constant 0.000000e+00 : f32
    %40 = vector.broadcast %cst_15 : f32 to vector<64x1xf32>
    %41 = arith.select %39, %33, %40 : vector<64x1xi1>, vector<64x1xf32>
    %42 = vector.shape_cast %41 : vector<64x1xf32> to vector<1x64x1xf32>
    %cst_16 = arith.constant dense<0.000000e+00> : vector<1xf32>
    %43 = vector.multi_reduction <add>, %42, %cst_16 [1, 2] : vector<1x64x1xf32> to vector<1xf32>
    %44 = vector.shape_cast %43 : vector<1xf32> to vector<1x1x1xf32>
    %45 = vector.extract %44[0, 0, 0] : f32 from vector<1x1x1xf32>
    %46 = vector.broadcast %45 : f32 to vector<1x1xf32>
    %47 = arith.addf %18, %46 : vector<1x1xf32>
    %c0_17 = arith.constant 0 : index
    %c0_18 = arith.constant 0 : index
    %48 = vector.load %arg6[%c0_17, %c0_18] : memref<1x1xf32, #tpu.memory_space<vmem>>, vector<1x1xf32>
    %49 = arith.addf %48, %47 : vector<1x1xf32>
    %c0_19 = arith.constant 0 : index
    %c0_20 = arith.constant 0 : index
    %50 = vector.load %arg6[%c0_19, %c0_20] : memref<1x1xf32, #tpu.memory_space<vmem>>, vector<1x1xf32>
    tpu.vector_store %arg6[%c0_19, %c0_20], %49 {strides = array<i32>} : memref<1x1xf32, #tpu.memory_space<vmem>>, vector<1x1xf32>,
    %c0_i32_21 = arith.constant 0 : i32
    %51 = arith.cmpi eq, %arg1, %c0_i32_21 : i32
    %52 = arith.extui %51 : i1 to i32
    %c0_i32_22 = arith.constant 0 : i32
    %53 = arith.cmpi ne, %52, %c0_i32_22 : i32
    scf.if %53 {
      %c0_23 = arith.constant 0 : index
      %c0_24 = arith.constant 0 : index
      %54 = vector.load %arg6[%c0_23, %c0_24] : memref<1x1xf32, #tpu.memory_space<vmem>>, vector<1x1xf32>
      %55 = vector.shape_cast %54 : vector<1x1xf32> to vector<1x1x1xf32>
      %cst_25 = arith.constant dense<0.000000e+00> : vector<1xf32>
      %56 = vector.multi_reduction <add>, %55, %cst_25 [1, 2] : vector<1x1x1xf32> to vector<1xf32>
      %57 = vector.shape_cast %56 : vector<1xf32> to vector<1x1x1xf32>
      %58 = vector.extract %57[0, 0, 0] : f32 from vector<1x1x1xf32>
      %59 = vector.broadcast %58 : f32 to vector<1x8x128xf32>
      %c0_26 = arith.constant 0 : index
      %c0_27 = arith.constant 0 : index
      %c0_28 = arith.constant 0 : index
      %60 = vector.load %arg5[%c0_26, %c0_27, %c0_28] : memref<1x8x128xf32, #tpu.memory_space<vmem>>, vector<1x8x128xf32>
      tpu.vector_store %arg5[%c0_26, %c0_27, %c0_28], %59 {strides = array<i32>} : memref<1x8x128xf32, #tpu.memory_space<vmem>>, vector<1x8x128xf32>,
    } else {
    }
    return
  }
  func.func @transform_0(%arg0: i32, %arg1: i32) -> (i32, i32) {
    %c1_i32 = arith.constant 1 : i32
    %0 = arith.muli %arg0, %c1_i32 : i32
    %1 = arith.addi %0, %arg1 : i32
    %c0_i32 = arith.constant 0 : i32
    %2 = arith.minsi %1, %c0_i32 : i32
    %c0_i32_0 = arith.constant 0 : i32
    %c0_i32_1 = arith.constant 0 : i32
    return %2, %c0_i32_0 : i32, i32
  }
  func.func @transform_1(%arg0: i32, %arg1: i32) -> (i32, i32) {
    %c1_i32 = arith.constant 1 : i32
    %0 = arith.muli %arg0, %c1_i32 : i32
    %1 = arith.addi %0, %arg1 : i32
    %c0_i32 = arith.constant 0 : i32
    %2 = arith.minsi %1, %c0_i32 : i32
    %c0_i32_0 = arith.constant 0 : i32
    %c0_i32_1 = arith.constant 0 : i32
    return %2, %c0_i32_0 : i32, i32
  }
  func.func @transform_2(%arg0: i32, %arg1: i32) -> (i32, i32) {
    %c1_i32 = arith.constant 1 : i32
    %0 = arith.muli %arg0, %c1_i32 : i32
    %1 = arith.addi %0, %arg1 : i32
    %c0_i32 = arith.constant 0 : i32
    %2 = arith.minsi %1, %c0_i32 : i32
    %c0_i32_0 = arith.constant 0 : i32
    %c0_i32_1 = arith.constant 0 : i32
    return %2, %c0_i32_0 : i32, i32
  }
  func.func @transform_3(%arg0: i32, %arg1: i32) -> (i32, i32, i32) {
    %c0_i32 = arith.constant 0 : i32
    %c0_i32_0 = arith.constant 0 : i32
    %c0_i32_1 = arith.constant 0 : i32
    return %arg0, %c0_i32, %c0_i32_0 : i32, i32, i32
  }
}

</mosaic_0001>

<bundles_post_ra>
// kernel: triplet_loss.1
= control target key start
LH: loop header
LB: loop body
LE: loop exit
PB: predicated region body
PF: predicated region fallthrough
CT: control target
= control target key end

     0   :  { %8 = vsyncpa [#allocation4], 0  ;;  %s653_s0 = inlined_call_operand.hbm [shape: f32[64,128], index: 0, kind: input, shape index: {}]   ;;  %s654_s1 = inlined_call_operand.hbm [shape: f32[64,128], index: 1, kind: input, shape index: {}]   ;;  %s655_s2 = inlined_call_operand.hbm [shape: f32[64,128], index: 2, kind: input, shape index: {}]   ;;  %s656_s3 = inlined_call_operand.vmem [shape: f32[1,8,128], index: 3, kind: output, shape index: {}]  }
   0x1   :  { %9 = vsyncpa [#allocation6], 0  ;;  %s39_s14 = sshll.u32 %s654_s1, 4  ;;  %s518_s15 = smov [#allocation5]   ;;  %s40_s14 = int_to_ptr.hbm [resolvable:$true] %s39_s14 }
   0x2   :  { %s41_s16 = sshll.u32 %s518_s15, 4  ;;  %s20_s19 = sshll.u32 %s653_s0, 4  ;;  %s42_s16 = int_to_ptr.vmem [resolvable:$true] %s41_s16  ;;  %s21_s19 = int_to_ptr.hbm [resolvable:$true] %s20_s19 }
   0x3   :  { %s519_s20 = smov 128   ;;  %s520_s21 = smov 8  }
   0x4   :  { %47 = dma.hbm_to_vmem [thread:$0]  %s40_s14, 1024, %s42_s16, [#allocation6], %s519_s20, %s519_s20, %s520_s21  }
   0x5   :  { %s521_s22 = smov [#allocation3]   ;;  %s58_s26 = sshll.u32 %s655_s2, 4  ;;  %s59_s26 = int_to_ptr.hbm [resolvable:$true] %s58_s26 }
   0x6   :  { %s22_s23 = sshll.u32 %s521_s22, 4  ;;  %s522_s1 = smov [#allocation7]   ;;  %s23_s23 = int_to_ptr.vmem [resolvable:$true] %s22_s23 }
   0x7   :  { %28 = dma.hbm_to_vmem [thread:$0]  %s21_s19, 1024, %s23_s23, [#allocation4], %s519_s20, %s519_s20, %s520_s21  }
   0x8   :  { %s60_s27 = sshll.u32 %s522_s1, 4  ;;  %s61_s27 = int_to_ptr.vmem [resolvable:$true] %s60_s27 }
   0x9   :  { %66 = dma.hbm_to_vmem [thread:$0]  %s59_s26, 1024, %s61_s27, [#allocation6], %s519_s20, %s519_s20, %s520_s21  }
   0xa   :  { %514 = dma.done.wait [#allocation4], 1024  }
   0xb   :  { %515 = vsyncadd [#allocation4], 4294966272 }
   0xc   :  { %516 = dma.done.wait [#allocation6], 2048  }
   0xd   :  { %517 = vsyncadd [#allocation6], 4294965248  ;;  %v109_v0 = vld [vmem:[#allocation5 + $0x20] sm:$0xff]  ;;  %v107_v2 = vld [vmem:[#allocation5 + $0x10] sm:$0xff]  ;;  %vm365_vm12 = vcmask 7168  }
   0xe   :  { %v117_v1 = vld [vmem:[#allocation7 + $0x20] sm:$0xff]  ;;  %v115_v4 = vld [vmem:[#allocation7 + $0x10] sm:$0xff]  ;;  %v110_v9 = vld [vmem:[#allocation5 + $0x28] sm:$0xff] }
   0xf   :  { %v141_v3 = vsub.f32 %v109_v0, %v117_v1  ;;  %v105_v5 = vld [vmem:[#allocation5] sm:$0xff]  ;;  %v139_v7 = vsub.f32 %v107_v2, %v115_v4  ;;  %v118_v10 = vld [vmem:[#allocation7 + $0x28] sm:$0xff]  ;;  %v108_v11 = vld [vmem:[#allocation5 + $0x18] sm:$0xff] }
  0x10   :  { %v113_v6 = vld [vmem:[#allocation7] sm:$0xff]  ;;  %v116_v13 = vld [vmem:[#allocation7 + $0x18] sm:$0xff]  ;;  %v106_v14 = vld [vmem:[#allocation5 + $0x8] sm:$0xff]  ;;  %v142_v18 = vsub.f32 %v110_v9, %v118_v10 }
  0x11   :  { %v137_v8 = vsub.f32 %v105_v5, %v113_v6  ;;  %v149_v12 = vmul.f32 %v141_v3, %v141_v3  ;;  %v114_v15 = vld [vmem:[#allocation7 + $0x8] sm:$0xff]  ;;  %v147_v16 = vmul.f32 %v139_v7, %v139_v7  ;;  %v140_v19 = vsub.f32 %v108_v11, %v116_v13  ;;  %v112_v24 = vld [vmem:[#allocation5 + $0x38] sm:$0xff]  ;;  %v97_v25 = vld [vmem:[#allocation3] sm:$0xff] }
  0x12   :  { %v138_v20 = vsub.f32 %v106_v14, %v114_v15  ;;  %v150_v21 = vmul.f32 %v142_v18, %v142_v18  ;;  %v120_v26 = vld [vmem:[#allocation7 + $0x38] sm:$0xff]  ;;  %v111_v27 = vld [vmem:[#allocation5 + $0x30] sm:$0xff]  ;;  %v121_v29 = vsub.f32 %v97_v25, %v113_v6  ;;  %v98_v36 = vld [vmem:[#allocation3 + $0x8] sm:$0xff] }
  0x13   :  { %v145_v17 = vmul.f32 %v137_v8, %v137_v8  ;;  %197 = vadd.xlane.f32.xlu2 %v149_v12  ;;  %193 = vadd.xlane.f32.xlu1 %v147_v16  ;;  %v148_v22 = vmul.f32 %v140_v19, %v140_v19  ;;  %v119_v28 = vld [vmem:[#allocation7 + $0x30] sm:$0xff]  ;;  %v144_v30 = vsub.f32 %v112_v24, %v120_v26  ;;  %v100_v35 = vld [vmem:[#allocation3 + $0x18] sm:$0xff]  ;;  %v101_v45 = vld [vmem:[#allocation3 + $0x20] sm:$0xff] }
  0x14   :  { %v146_v23 = vmul.f32 %v138_v20, %v138_v20  ;;  %v143_v31 = vsub.f32 %v111_v27, %v119_v28  ;;  %v129_v32 = vmul.f32 %v121_v29, %v121_v29  ;;  %v99_v37 = vld [vmem:[#allocation3 + $0x10] sm:$0xff]  ;;  %v124_v38 = vsub.f32 %v100_v35, %v116_v13  ;;  %v102_v46 = vld [vmem:[#allocation3 + $0x28] sm:$0xff]  ;;  %v104_v53 = vld [vmem:[#allocation3 + $0x38] sm:$0xff] }
  0x15   :  { %189 = vadd.xlane.f32.xlu0 %v145_v17  ;;  %v152_v33 = vmul.f32 %v144_v30, %v144_v30  ;;  %v122_v39 = vsub.f32 %v98_v36, %v114_v15  ;;  %v123_v40 = vsub.f32 %v99_v37, %v115_v4  ;;  %v103_v44 = vld [vmem:[#allocation3 + $0x30] sm:$0xff]  ;;  %v125_v48 = vsub.f32 %v101_v45, %v117_v1 }
  0x16   :  { %v151_v34 = vmul.f32 %v143_v31, %v143_v31  ;;  %v132_v41 = vmul.f32 %v124_v38, %v124_v38  ;;  %v127_v47 = vsub.f32 %v103_v44, %v119_v28  ;;  %v126_v49 = vsub.f32 %v102_v46, %v118_v10 }
  0x17   :  { %v130_v42 = vmul.f32 %v122_v39, %v122_v39  ;;  %v131_v43 = vmul.f32 %v123_v40, %v123_v40  ;;  %v133_v51 = vmul.f32 %v125_v48, %v125_v48  ;;  %v128_v54 = vsub.f32 %v104_v53, %v120_v26 }
  0x18   :  { %v135_v50 = vmul.f32 %v127_v47, %v127_v47  ;;  %v134_v52 = vmul.f32 %v126_v49, %v126_v49 }
  0x19   :  { %v136_v55 = vmul.f32 %v128_v54, %v128_v54 }
  0x1b   :  { %199 = vadd.xlane.f32.xlu2 %v150_v21  ;;  %195 = vadd.xlane.f32.xlu1 %v148_v22 }
  0x1d   :  { %191 = vadd.xlane.f32.xlu0 %v146_v23 }
  0x23   :  { %173 = vadd.xlane.f32.xlu2 %v129_v32  ;;  %203 = vadd.xlane.f32.xlu1 %v152_v33 }
  0x25   :  { %201 = vadd.xlane.f32.xlu0 %v151_v34 }
  0x2b   :  { %179 = vadd.xlane.f32.xlu2 %v132_v41  ;;  %177 = vadd.xlane.f32.xlu1 %v131_v43 }
  0x2d   :  { %175 = vadd.xlane.f32.xlu0 %v130_v42 }
  0x33   :  { %185 = vadd.xlane.f32.xlu2 %v135_v50  ;;  %183 = vadd.xlane.f32.xlu1 %v134_v52 }
  0x35   :  { %181 = vadd.xlane.f32.xlu0 %v133_v51 }
  0x3d   :  { %187 = vadd.xlane.f32.xlu0 %v136_v55 }
  0x86   :  { %v553_v56 = vpop.xlane.xlu2 %197  ;;  %v194_v57 = vpop.xlane.xlu1 %193 }
  0x87   :  { %426 = vrsqrt.f32 %v553_v56  ;;  %vm260_vm0 = vcmp.eq.f32.partialorder %v553_v56, inf  ;;  %vm262_vm1 = vcmp.eq.f32.partialorder %v553_v56, 0.0  ;;  %vm236_vm2 = vcmp.eq.f32.partialorder %v194_v57, inf }
  0x88   :  { %v556_v58 = vpop.xlane.xlu0 %189  ;;  %428 = vrsqrt.f32 %v194_v57  ;;  %vm238_vm3 = vcmp.eq.f32.partialorder %v194_v57, 0.0  ;;  %v239_v13 = vand.u32 2147483648, %v194_v57  ;;  %v263_v33 = vand.u32 2147483648, %v553_v56 }
  0x89   :  { %430 = vrsqrt.f32 %v556_v58  ;;  %vm212_vm4 = vcmp.eq.f32.partialorder %v556_v58, inf  ;;  %vm214_vm5 = vcmp.eq.f32.partialorder %v556_v58, 0.0  ;;  %v215_v23 = vand.u32 2147483648, %v556_v58 }
  0x8d   :  { %v427_v59 = vpop.eup %426 }
  0x8e   :  { %v429_v60 = vpop.eup %428  ;;  %v254_v61 = vmul.f32 %v427_v59, %v553_v56  ;;  %v560_v62 = vpop.xlane.xlu2 %199 }
  0x8f   :  { %v431_v63 = vpop.eup %430  ;;  %v230_v0 = vmul.f32 %v429_v60, %v194_v57  ;;  %432 = vrsqrt.f32 %v560_v62  ;;  %v563_v1 = vpop.xlane.xlu1 %195  ;;  %vm272_vm7 = vcmp.eq.f32.partialorder %v560_v62, inf  ;;  %vm274_vm8 = vcmp.eq.f32.partialorder %v560_v62, 0.0 }
  0x90   :  { %v565_v2 = vpop.xlane.xlu0 %191  ;;  %v255_v3 = vmul.f32 %v427_v59, %v254_v61  ;;  %v206_v4 = vmul.f32 %v431_v63, %v556_v58  ;;  %434 = vrsqrt.f32 %v563_v1  ;;  %vm248_vm10 = vcmp.eq.f32.partialorder %v563_v1, inf }
  0x91   :  { %v231_v5 = vmul.f32 %v429_v60, %v230_v0  ;;  %436 = vrsqrt.f32 %v565_v2  ;;  %vm224_vm6 = vcmp.eq.f32.partialorder %v565_v2, inf  ;;  %vm226_vm9 = vcmp.eq.f32.partialorder %v565_v2, 0.0 }
  0x92   :  { %v256_v6 = vmul.f32 0.5, %v255_v3  ;;  %v207_v7 = vmul.f32 %v431_v63, %v206_v4  ;;  %v227_v52 = vand.u32 2147483648, %v565_v2  ;;  %vm250_vm11 = vcmp.eq.f32.partialorder %v563_v1, 0.0 }
  0x93   :  { %v232_v8 = vmul.f32 0.5, %v231_v5  ;;  %v251_v5 = vand.u32 2147483648, %v563_v1 }
  0x94   :  { %v208_v9 = vmul.f32 0.5, %v207_v7  ;;  %v257_v10 = vsub.f32 1.5, %v256_v6 }
  0x95   :  { %v433_v11 = vpop.eup %432  ;;  %v233_v12 = vsub.f32 1.5, %v232_v8 }
  0x96   :  { %v435_v14 = vpop.eup %434  ;;  %v266_v15 = vmul.f32 %v433_v11, %v560_v62  ;;  %v209_v16 = vsub.f32 1.5, %v208_v9  ;;  %v258_v17 = vmul.f32 %v427_v59, %v257_v10  ;;  %v174_v43 = vpop.xlane.xlu2 %173  ;;  %v275_v59 = vand.u32 2147483648, %v560_v62 }
  0x97   :  { %v437_v18 = vpop.eup %436  ;;  %v242_v19 = vmul.f32 %v435_v14, %v563_v1  ;;  %v575_v20 = vpop.xlane.xlu1 %203  ;;  %v234_v22 = vmul.f32 %v429_v60, %v233_v12  ;;  %v317_v9 = vmul.f32 0.5, %v174_v43 }
  0x98   :  { %v577_v21 = vpop.xlane.xlu0 %201  ;;  %v267_v24 = vmul.f32 %v433_v11, %v266_v15  ;;  %v218_v25 = vmul.f32 %v437_v18, %v565_v2  ;;  %438 = vrsqrt.f32 %v575_v20  ;;  %v210_v26 = vmul.f32 %v431_v63, %v209_v16 }
  0x99   :  { %v243_v27 = vmul.f32 %v435_v14, %v242_v19  ;;  %440 = vrsqrt.f32 %v577_v21  ;;  %v235_v28 = vmul.f32 %v234_v22, %v194_v57  ;;  %v259_v29 = vmul.f32 %v258_v17, %v553_v56 }
  0x9a   :  { %v268_v30 = vmul.f32 0.5, %v267_v24  ;;  %v219_v31 = vmul.f32 %v437_v18, %v218_v25  ;;  %v211_v32 = vmul.f32 %v210_v26, %v556_v58  ;;  %vm296_vm13 = vcmp.eq.f32.partialorder %v575_v20, inf }
  0x9b   :  { %v244_v34 = vmul.f32 0.5, %v243_v27  ;;  %v237_v35 = vsel %vm236_vm2, %v194_v57, %v235_v28  ;;  %v261_v36 = vsel %vm260_vm0, %v553_v56, %v259_v29  ;;  %vm298_vm14 = vcmp.eq.f32.partialorder %v575_v20, 0.0 }
  0x9c   :  { %v220_v37 = vmul.f32 0.5, %v219_v31  ;;  %v240_v38 = vsel %vm238_vm3, %v239_v13, %v237_v35  ;;  %v213_v39 = vsel %vm212_vm4, %v556_v58, %v211_v32  ;;  %v264_v40 = vsel %vm262_vm1, %v263_v33, %v261_v36 }
  0x9d   :  { %v303_v41 = vsub.f32 1.0, %v240_v38  ;;  %v216_v42 = vsel %vm214_vm5, %v215_v23, %v213_v39  ;;  %v305_v44 = vsub.f32 1.0, %v264_v40  ;;  %v269_v45 = vsub.f32 1.5, %v268_v30 }
  0x9e   :  { %v439_v46 = vpop.eup %438  ;;  %v221_v47 = vsub.f32 1.5, %v220_v37  ;;  %v301_v48 = vsub.f32 1.0, %v216_v42  ;;  %v245_v49 = vsub.f32 1.5, %v244_v34  ;;  %v180_v25 = vpop.xlane.xlu2 %179  ;;  %v299_v32 = vand.u32 2147483648, %v575_v20 }
  0x9f   :  { %v441_v50 = vpop.eup %440  ;;  %v290_v51 = vmul.f32 %v439_v46, %v575_v20  ;;  %v311_v54 = vmax.f32 %v303_v41, 0.0  ;;  %v270_v55 = vmul.f32 %v433_v11, %v269_v45  ;;  %v178_v58 = vpop.xlane.xlu1 %177  ;;  %v313_v63 = vmax.f32 %v305_v44, 0.0 }
  0xa0   :  { %v176_v53 = vpop.xlane.xlu0 %175  ;;  %v278_v56 = vmul.f32 %v441_v50, %v577_v21  ;;  %v222_v57 = vmul.f32 %v437_v18, %v221_v47  ;;  %v309_v61 = vmax.f32 %v301_v48, 0.0  ;;  %v246_v4 = vmul.f32 %v435_v14, %v245_v49 }
  0xa1   :  { %v291_v60 = vmul.f32 %v439_v46, %v290_v51  ;;  %v271_v3 = vmul.f32 %v270_v55, %v560_v62  ;;  %v327_v7 = vmul.f32 0.5, %v311_v54  ;;  %v329_v15 = vmul.f32 0.5, %v313_v63 }
  0xa2   :  { %v223_v0 = vmul.f32 %v222_v57, %v565_v2  ;;  %v279_v6 = vmul.f32 %v441_v50, %v278_v56  ;;  %v325_v8 = vmul.f32 0.5, %v309_v61  ;;  %v247_v12 = vmul.f32 %v246_v4, %v563_v1 }
  0xa3   :  { %v273_v11 = vsel %vm272_vm7, %v560_v62, %v271_v3  ;;  %v292_v13 = vmul.f32 0.5, %v291_v60  ;;  %v335_v23 = vmul.f32 %v327_v7, %v311_v54  ;;  %v319_v24 = vmul.f32 0.5, %v178_v58 }
  0xa4   :  { %v225_v10 = vsel %vm224_vm6, %v565_v2, %v223_v0  ;;  %v276_v16 = vsel %vm274_vm8, %v275_v59, %v273_v11  ;;  %v249_v19 = vsel %vm248_vm10, %v563_v1, %v247_v12  ;;  %v280_v26 = vmul.f32 0.5, %v279_v6 }
  0xa5   :  { %v228_v14 = vsel %vm226_vm9, %v227_v52, %v225_v10  ;;  %v306_v18 = vsub.f32 1.0, %v276_v16  ;;  %v293_v22 = vsub.f32 1.5, %v292_v13  ;;  %v252_v2 = vsel %vm250_vm11, %v251_v5, %v249_v19 }
  0xa6   :  { %v302_v17 = vsub.f32 1.0, %v228_v14  ;;  %v333_v28 = vmul.f32 %v325_v8, %v309_v61  ;;  %v304_v30 = vsub.f32 1.0, %v252_v2  ;;  %v281_v33 = vsub.f32 1.5, %v280_v26  ;;  %v186_v0 = vpop.xlane.xlu2 %185 }
  0xa7   :  { %v314_v62 = vmax.f32 %v306_v18, 0.0  ;;  %v294_v31 = vmul.f32 %v439_v46, %v293_v22  ;;  %v318_v35 = vmul.f32 0.5, %v176_v53  ;;  %v337_v36 = vmul.f32 %v329_v15, %v313_v63  ;;  %v184_v37 = vpop.xlane.xlu1 %183 }
  0xa8   :  { %v310_v27 = vmax.f32 %v302_v17, 0.0  ;;  %v182_v29 = vpop.xlane.xlu0 %181  ;;  %v320_v38 = vmul.f32 0.5, %v180_v25  ;;  %v343_v1 = vadd.f32 %v335_v23, %v319_v24  ;;  %v312_v39 = vmax.f32 %v304_v30, 0.0 }
  0xa9   :  { %v295_v40 = vmul.f32 %v294_v31, %v575_v20  ;;  %v282_v41 = vmul.f32 %v441_v50, %v281_v33  ;;  %v341_v43 = vadd.f32 %v333_v28, %v317_v9  ;;  %v321_v44 = vmul.f32 0.5, %v182_v29 }
  0xaa   :  { %v326_v34 = vmul.f32 0.5, %v310_v27  ;;  %v330_v45 = vmul.f32 0.5, %v314_v62  ;;  %v322_v47 = vmul.f32 0.5, %v184_v37  ;;  %v328_v48 = vmul.f32 0.5, %v312_v39 }
  0xab   :  { %v297_v46 = vsel %vm296_vm13, %v575_v20, %v295_v40  ;;  %v283_v49 = vmul.f32 %v282_v41, %v577_v21  ;;  %vm284_vm15 = vcmp.eq.f32.partialorder %v577_v21, inf  ;;  %v287_v50 = vand.u32 2147483648, %v577_v21 }
  0xac   :  { %v334_v42 = vmul.f32 %v326_v34, %v310_v27  ;;  %v300_v52 = vsel %vm298_vm14, %v299_v32, %v297_v46  ;;  %v336_v53 = vmul.f32 %v328_v48, %v312_v39  ;;  %vm286_vm0 = vcmp.eq.f32.partialorder %v577_v21, 0.0 }
  0xad   :  { %v308_v54 = vsub.f32 1.0, %v300_v52  ;;  %v285_v55 = vsel %vm284_vm15, %v577_v21, %v283_v49  ;;  %v366_v57 = vsel %vm365_vm12, %v341_v43, 0.0  ;;  %v338_v58 = vmul.f32 %v330_v45, %v314_v62 }
  0xae   :  { %v342_v51 = vadd.f32 %v334_v42, %v318_v35  ;;  %v288_v59 = vsel %vm286_vm0, %v287_v50, %v285_v55  ;;  %v344_v61 = vadd.f32 %v336_v53, %v320_v38  ;;  %v369_v3 = vsel %vm365_vm12, %v343_v1, 0.0 }
  0xaf   :  { %v316_v20 = vmax.f32 %v308_v54, 0.0  ;;  %v307_v63 = vsub.f32 1.0, %v288_v59  ;;  %v345_v4 = vadd.f32 %v337_v36, %v321_v44  ;;  %v346_v9 = vadd.f32 %v338_v58, %v322_v47 }
  0xb0   :  { %v367_v56 = vsel %vm365_vm12, %v342_v51, 0.0  ;;  %v188_v5 = vpop.xlane.xlu0 %187  ;;  %v371_v21 = vsel %vm365_vm12, %v344_v61, 0.0  ;;  %v323_v10 = vmul.f32 0.5, %v186_v0  ;;  %vm95_vm1 = vcmask 0  }
  0xb1   :  { %v368_v60 = vadd.f32 %v367_v56, %v366_v57  ;;  %v332_v7 = vmul.f32 0.5, %v316_v20  ;;  %v315_v8 = vmax.f32 %v307_v63, 0.0  ;;  %v324_v13 = vmul.f32 0.5, %v188_v5 }
  0xb2   :  { %v373_v15 = vsel %vm365_vm12, %v345_v4, 0.0  ;;  %v375_v18 = vsel %vm365_vm12, %v346_v9, 0.0  ;;  %v523_v27 = vmov 0.0  }
  0xb3   :  { %v370_v6 = vadd.f32 %v369_v3, %v368_v60  ;;  %v340_v12 = vmul.f32 %v332_v7, %v316_v20  ;;  %v331_v14 = vmul.f32 0.5, %v315_v8  ;;  %96 = vst.msk [vmem:[#allocation2] sm:$0x1] %vm95_vm1, %v523_v27 }
  0xb5   :  { %v372_v11 = vadd.f32 %v371_v21, %v370_v6  ;;  %v339_v16 = vmul.f32 %v331_v14, %v315_v8  ;;  %v348_v19 = vadd.f32 %v340_v12, %v324_v13 }
  0xb7   :  { %v374_v17 = vadd.f32 %v373_v15, %v372_v11  ;;  %v347_v22 = vadd.f32 %v339_v16, %v323_v10  ;;  %v379_v25 = vsel %vm365_vm12, %v348_v19, 0.0 }
  0xb9   :  { %v376_v23 = vadd.f32 %v375_v18, %v374_v17  ;;  %v377_v24 = vsel %vm365_vm12, %v347_v22, 0.0 }
  0xba   :  { %v392_v34 = vld [vmem:[#allocation2] sm:$0x1] }
  0xbb   :  { %v378_v2 = vadd.f32 %v377_v24, %v376_v23 }
  0xbd   :  { %v380_v26 = vadd.f32 %v379_v25, %v378_v2 }
  0xbf   :  { %381 = vadd.xlane.f32.xlu1 %v380_v26 }
 0x132   :  { %v382_v28 = vpop.xlane.xlu1 %381 }
 0x133   :  { %v383_v62 = vrot.slane %v382_v28, 4 }
 0x135   :  { %v384_v29 = vadd.f32 %v383_v62, %v382_v28 }
 0x137   :  { %v385_v30 = vrot.slane %v384_v29, 2 }
 0x139   :  { %v386_v31 = vadd.f32 %v385_v30, %v384_v29 }
 0x13b   :  { %v387_v32 = vrot.slane %v386_v31, 1 }
 0x13d   :  { %v388_v33 = vadd.f32 %v387_v32, %v386_v31 }
 0x13f   :  { %416 = vpush %v388_v33 }
 0x170   :  { %s417_s0 = spop %416 }
 0x171   :  { %v390_v35 = vstv %s417_s0 }
 0x172   :  { %v393_v36 = vadd.f32 %v392_v34, %v390_v35 }
 0x174   :  { %395 = vst.msk [vmem:[#allocation2] sm:$0x1] %vm95_vm1, %v393_v36 }
 0x17b   :  { %v399_v37 = vld [vmem:[#allocation2] sm:$0x1] }
 0x17c   :  { %418 = vpush %v399_v37 }
 0x1ad   :  { %s419_s2 = spop %418 }
 0x1ae   :  { %v402_v38 = vstv %s419_s2 }
 0x1af   :  { %403 = vst [vmem:[%s656_s3] sm:$0xff] %v402_v38 }
 0x1b0   :  { %408 = vsyncpa [#allocation4], 1 }
 0x1b1   :  { %409 = vsyncpa [#allocation6], 1 }

</bundles_post_ra>
